<compile_context>
chip_gen: v5e
topology: v5e:2x2
jax: 0.10.0
libtpu: 0.0.40
codegen_flags: <defaults>
</compile_context>

<pallas_src>
import functools
import math

import jax
import jax.numpy as jnp
from jax.experimental import pallas as pl
from jax.experimental.pallas import tpu as pltpu


def _linear_kernel(*refs, use_mask, use_scratch, nk):
    """One (tm, tn) output tile; K-reduction on grid axis 2 (size nk)."""
    if use_scratch:
        acc_ref = refs[-1]
        refs = refs[:-1]
    if use_mask:
        mask_ref, x_ref, w_ref, b_ref, o_ref = refs
    else:
        x_ref, w_ref, b_ref, o_ref = refs

    x = x_ref[...]
    if use_mask:
        # token_drop: (tm, 1) keep-mask broadcast over the lane dim; hides
        # under the MXU (VALU slots are otherwise idle in this kernel).
        x = x * mask_ref[...].astype(x.dtype)

    # x: (tm, tk) @ w: (tk, tn) -> (tm, tn), f32 accumulation on the MXU.
    part = jnp.dot(x, w_ref[...], preferred_element_type=jnp.float32)

    if nk == 1:
        # Whole K fits in one step: fused bias add + single lane-dense store.
        o_ref[...] = (part + b_ref[...]).astype(o_ref.dtype)
    elif not use_scratch:
        # f32 output: accumulate directly into the resident output tile.
        k = pl.program_id(2)

        @pl.when(k == 0)
        def _():
            o_ref[...] = jnp.broadcast_to(b_ref[...], o_ref.shape)

        o_ref[...] += part
    else:
        # Non-f32 output: f32 VMEM accumulator, bias fused into the final store.
        k = pl.program_id(2)

        @pl.when(k == 0)
        def _():
            acc_ref[...] = jnp.zeros_like(acc_ref)

        acc_ref[...] += part

        @pl.when(k == pl.num_programs(2) - 1)
        def _():
            o_ref[...] = (acc_ref[...] + b_ref[...]).astype(o_ref.dtype)


def _round_up(v: int, m: int) -> int:
    return (v + m - 1) // m * m


def linear_forward(x, weight, bias=None, *, train=False, dropout_prob=0.0,
                   force_drop_ids=None, rng=None,
                   tm=512, tn=512, tk=512,
                   vmem_limit_bytes=48 * 1024 * 1024):
    """Pallas equivalent of Linear.forward: token_drop (optional) -> x @ W.T + b."""
    M, K = x.shape
    N, K2 = weight.shape
    assert K == K2, (K, K2)

    op_dtype = x.dtype          # feed the MXU the input's native dtype (bf16-friendly)
    out_dtype = x.dtype

    # --- token_drop keep-mask (fused into the kernel) -----------------------
    use_mask = (train and dropout_prob > 0.0) or (force_drop_ids is not None)
    mask = None
    if use_mask:
        if force_drop_ids is None:
            assert rng is not None, "rng key required for random token_drop"
            drop = jax.random.uniform(rng, (M,)) < dropout_prob
        else:
            drop = force_drop_ids == 1
        mask = jnp.where(drop, 0, 1).astype(op_dtype)[:, None]      # (M, 1) keep-mask

    # Weight: PyTorch layout (N, K) -> transpose ONCE to (K, N) in the wrapper.
    wt = weight.astype(op_dtype).T                                   # (K, N)
    bf = (bias.astype(jnp.float32) if bias is not None
          else jnp.zeros((N,), jnp.float32))

    # --- tile selection ------------------------------------------------------
    tm = min(tm, _round_up(M, 8))
    tn = min(tn, _round_up(N, 128))
    tk = min(tk, _round_up(K, 128))

    # Megacore (v7x): avoid a 1x1 parallel grid when N allows splitting.
    if _round_up(M, tm) // tm == 1 and _round_up(N, tn) // tn == 1:
        n128 = _round_up(N, 128)
        if n128 >= 256:
            tn = _round_up((n128 + 1) // 2, 128)

    Mp, Np, Kp = _round_up(M, tm), _round_up(N, tn), _round_up(K, tk)
    grid = (Mp // tm, Np // tn, Kp // tk)
    nk = grid[2]

    acc_in_out = jnp.dtype(out_dtype) == jnp.dtype(jnp.float32)
    use_scratch = (nk > 1) and not acc_in_out

    # --- pad only when shapes aren't already tile multiples ------------------
    xp = x.astype(op_dtype)
    if (Mp, Kp) != (M, K):
        xp = jnp.zeros((Mp, Kp), op_dtype).at[:M, :K].set(xp)
    wp = wt
    if (Kp, Np) != (K, N):
        wp = jnp.zeros((Kp, Np), op_dtype).at[:K, :N].set(wp)
    bp = bf[None, :]
    if Np != N:
        bp = jnp.zeros((1, Np), jnp.float32).at[0, :N].set(bf)
    if use_mask and Mp != M:
        mask = jnp.zeros((Mp, 1), op_dtype).at[:M, :].set(mask)

    # --- specs ----------------------------------------------------------------
    in_specs = []
    operands = []
    if use_mask:
        in_specs.append(pl.BlockSpec((tm, 1), lambda i, j, k: (i, 0)))     # keep-mask
        operands.append(mask)
    in_specs += [
        pl.BlockSpec((tm, tk), lambda i, j, k: (i, k)),                    # x tile
        pl.BlockSpec((tk, tn), lambda i, j, k: (k, j)),                    # (K,N) weight tile
        pl.BlockSpec((1, tn), lambda i, j, k: (0, j)),                     # bias tile
    ]
    operands += [xp, wp, bp]

    scratch_shapes = [pltpu.VMEM((tm, tn), jnp.float32)] if use_scratch else []

    gm, gn, gk = grid
    itemsize = jnp.dtype(op_dtype).itemsize
    cost = pl.CostEstimate(
        flops=2 * Mp * Np * Kp,
        transcendentals=0,
        # x is streamed gn times, W gm times (per the grid), output once.
        bytes_accessed=(itemsize * (Mp * Kp * gn + Kp * Np * gm)
                        + jnp.dtype(out_dtype).itemsize * Mp * Np + 4 * Np))

    kernel = functools.partial(_linear_kernel, use_mask=use_mask,
                               use_scratch=use_scratch, nk=nk)

    out_padded = pl.pallas_call(
        kernel,
        out_shape=jax.ShapeDtypeStruct((Mp, Np), out_dtype),
        grid_spec=pltpu.PrefetchScalarGridSpec(
            num_scalar_prefetch=0,
            grid=grid,
            in_specs=in_specs,
            out_specs=pl.BlockSpec((tm, tn), lambda i, j, k: (i, j)),
            scratch_shapes=scratch_shapes),
        compiler_params=pltpu.CompilerParams(
            dimension_semantics=("parallel", "parallel", "arbitrary"),
            vmem_limit_bytes=vmem_limit_bytes),
        cost_estimate=cost,
    )(*operands)

    if (Mp, Np) != (M, N):
        out_padded = out_padded[:M, :N]
    return out_padded


if __name__ == "__main__":
    key = jax.random.PRNGKey(0)
    k_x, k_w, k_b, k_x2, k_w2 = jax.random.split(key, 5)

    # --- small shape matching the module: in=32, out=64, batch=8 -------------
    B, IN, OUT = 8, 32, 64
    # weight_init(mode='kaiming_normal', fan_in=IN) * init_weight(=1):
    w = math.sqrt(1.0 / IN) * jax.random.normal(k_w, (OUT, IN), dtype=jnp.float32)
    # bias: kaiming_normal * init_bias(=0) -> zeros (kept explicit for semantics)
    b = 0.0 * (math.sqrt(1.0 / IN) * jax.random.normal(k_b, (OUT,), dtype=jnp.float32))
    x = jax.random.normal(k_x, (B, IN), dtype=jnp.float32)

    # eval-path forward: x @ W.T + b  (single-K-step kernel path)
    out = jax.block_until_ready(linear_forward(x, w, b, train=False))
    ref = x @ w.T + b
    assert out.shape == (B, OUT), out.shape
    assert jnp.allclose(out, ref, atol=1e-5, rtol=1e-5), "mismatch (no drop)"

    # forward with force_drop_ids (token_drop fused into the kernel)
    force = jnp.array([1, 0, 1, 0, 0, 0, 0, 1], dtype=jnp.int32)
    out_drop = jax.block_until_ready(linear_forward(x, w, b, force_drop_ids=force))
    x_dropped = jnp.where((force == 1)[:, None], jnp.zeros_like(x), x)
    ref_drop = x_dropped @ w.T + b
    assert jnp.allclose(out_drop, ref_drop, atol=1e-5, rtol=1e-5), "mismatch (drop)"

    # multi-K-step path (grid over K, f32 accumulate-into-output variant)
    B2, IN2, OUT2 = 16, 512, 256
    w2 = math.sqrt(1.0 / IN2) * jax.random.normal(k_w2, (OUT2, IN2), dtype=jnp.float32)
    b2 = jnp.zeros((OUT2,), jnp.float32)
    x2 = jax.random.normal(k_x2, (B2, IN2), dtype=jnp.float32)
    out2 = jax.block_until_ready(linear_forward(x2, w2, b2, tk=256))     # 2 K steps
    ref2 = x2 @ w2.T + b2
    assert jnp.allclose(out2, ref2, atol=1e-4, rtol=1e-4), "mismatch (multi-K f32)"

    # bf16 operands (native-dtype MXU feed, f32 accumulation, scratch epilogue)
    out_bf = jax.block_until_ready(
        linear_forward(x2.astype(jnp.bfloat16), w2, b2, tk=256))
    assert out_bf.dtype == jnp.bfloat16
    assert jnp.allclose(out_bf.astype(jnp.float32), ref2, atol=1e-1, rtol=5e-2), \
        "mismatch (multi-K bf16)"

    print("KERNEL_OK")
</pallas_src>

<mosaic_0001>
module attributes {stable_mosaic.version = 11 : i64} {
  func.func @_linear_kernel(%arg0: i32, %arg1: i32, %arg2: i32, %arg3: memref<8x128xf32, #tpu.memory_space<vmem>>, %arg4: memref<128x128xf32, #tpu.memory_space<vmem>>, %arg5: memref<1x128xf32, #tpu.memory_space<vmem>>, %arg6: memref<8x128xf32, #tpu.memory_space<vmem>>) attributes {dimension_semantics = [#tpu.dimension_semantics<parallel>, #tpu.dimension_semantics<parallel>, #tpu.dimension_semantics<arbitrary>], iteration_bounds = array<i64: 1, 1, 1>, scalar_prefetch = 0 : i64, scratch_operands = 0 : i64, tpu.core_type = #tpu.core_type<tc>, window_params = [{transform_indices = @transform_0, window_bounds = array<i64: 8, 128>}, {transform_indices = @transform_1, window_bounds = array<i64: 128, 128>}, {transform_indices = @transform_2, window_bounds = array<i64: 1, 128>}, {transform_indices = @transform_3, window_bounds = array<i64: 8, 128>}]} {
    %c0 = arith.constant 0 : index
    %c0_0 = arith.constant 0 : index
    %0 = vector.load %arg3[%c0, %c0_0] : memref<8x128xf32, #tpu.memory_space<vmem>>, vector<8x128xf32>
    %c0_1 = arith.constant 0 : index
    %c0_2 = arith.constant 0 : index
    %1 = vector.load %arg4[%c0_1, %c0_2] : memref<128x128xf32, #tpu.memory_space<vmem>>, vector<128x128xf32>
    %cst = arith.constant dense<0.000000e+00> : vector<8x128xf32>
    %2 = tpu.matmul %0, %1, %cst {dimension_numbers = #tpu.dot_dimension_numbers<[1], [0], [0], [1], [0, 0, 1, 1], [], []>} : vector<8x128xf32>, vector<128x128xf32>, vector<8x128xf32> -> vector<8x128xf32>
    %c0_3 = arith.constant 0 : index
    %c0_4 = arith.constant 0 : index
    %3 = vector.load %arg5[%c0_3, %c0_4] : memref<1x128xf32, #tpu.memory_space<vmem>>, vector<1x128xf32>
    %4 = vector.broadcast %3 : vector<1x128xf32> to vector<8x128xf32>
    %5 = arith.addf %2, %4 : vector<8x128xf32>
    %c0_5 = arith.constant 0 : index
    %c0_6 = arith.constant 0 : index
    %6 = vector.load %arg6[%c0_5, %c0_6] : memref<8x128xf32, #tpu.memory_space<vmem>>, vector<8x128xf32>
    tpu.vector_store %arg6[%c0_5, %c0_6], %5 {strides = array<i32>} : memref<8x128xf32, #tpu.memory_space<vmem>>, vector<8x128xf32>,
    return
  }
  func.func @transform_0(%arg0: i32, %arg1: i32, %arg2: i32) -> (i32, i32) {
    %c0_i32 = arith.constant 0 : i32
    return %arg0, %arg2 : i32, i32
  }
  func.func @transform_1(%arg0: i32, %arg1: i32, %arg2: i32) -> (i32, i32) {
    %c0_i32 = arith.constant 0 : i32
    return %arg2, %arg1 : i32, i32
  }
  func.func @transform_2(%arg0: i32, %arg1: i32, %arg2: i32) -> (i32, i32) {
    %c0_i32 = arith.constant 0 : i32
    %c0_i32_0 = arith.constant 0 : i32
    return %c0_i32, %arg1 : i32, i32
  }
  func.func @transform_3(%arg0: i32, %arg1: i32, %arg2: i32) -> (i32, i32) {
    %c0_i32 = arith.constant 0 : i32
    return %arg0, %arg1 : i32, i32
  }
}

</mosaic_0001>

<bundles_post_ra>
// kernel: tpu_custom_call.1
= control target key start
LH: loop header
LB: loop body
LE: loop exit
PB: predicated region body
PF: predicated region fallthrough
CT: control target
= control target key end

     0   :  { %8 = vsyncpa [#allocation3], 0  ;;  %s226_s0 = inlined_call_operand.hbm [shape: f32[8,128], index: 0, kind: input, shape index: {}]   ;;  %s227_s1 = inlined_call_operand.hbm [shape: f32[128,128], index: 1, kind: input, shape index: {}]   ;;  %s228_s2 = inlined_call_operand.vmem [shape: f32[1,128], index: 2, kind: input, shape index: {}]   ;;  %s229_s3 = inlined_call_operand.hbm [shape: f32[8,128], index: 3, kind: output, shape index: {}]  }
   0x1   :  { %9 = vsyncpa [#allocation6], 0 }
   0x2   :  { %10 = vsyncpa [#allocation4], 0  ;;  %s16_s14 = sshll.u32 %s226_s0, 4  ;;  %s189_s15 = smov [#allocation2]   ;;  %s17_s14 = int_to_ptr.hbm [resolvable:$true] %s16_s14 }
   0x3   :  { %s18_s16 = sshll.u32 %s189_s15, 4  ;;  %s26_s19 = sshll.u32 %s227_s1, 4  ;;  %s19_s16 = int_to_ptr.vmem [resolvable:$true] %s18_s16  ;;  %s27_s19 = int_to_ptr.hbm [resolvable:$true] %s26_s19 }
   0x4   :  { %21 = dma.hbm_to_vmem [thread:$0]  %s17_s14, 128, %s19_s16, [#allocation3]  }
   0x5   :  { %s190_s20 = smov [#allocation5]   ;;  %s191_s22 = smov 128  }
   0x6   :  { %s28_s21 = sshll.u32 %s190_s20, 4  ;;  %s192_s23 = smov 8   ;;  %s29_s21 = int_to_ptr.vmem [resolvable:$true] %s28_s21 }
   0x7   :  { %34 = dma.hbm_to_vmem [thread:$0]  %s27_s19, 2048, %s29_s21, [#allocation6], %s191_s22, %s191_s22, %s192_s23  }
   0x8   :  { %183 = dma.done.wait [#allocation3], 128  }
   0x9   :  { %184 = vsyncadd [#allocation3], 4294967168 }
   0xa   :  { %185 = dma.done.wait [#allocation6], 2048  }
   0xb   :  { %186 = vsyncadd [#allocation6], 4294965248  ;;  %v61_v0 = vld [vmem:[#allocation5 + $0x78] sm:$0xff]  ;;  %v60_v1 = vld [vmem:[#allocation5 + $0x70] sm:$0xff]  ;;  %s193_s24 = smov [#allocation7]   ;;  %s94_s28 = sshll.u32 %s229_s3, 4  ;;  %s95_s28 = int_to_ptr.hbm [resolvable:$true] %s94_s28 }
   0xc   :  { %66 = vmatpush.msra.mxu0 %v61_v0  ;;  %v59_v2 = vld [vmem:[#allocation5 + $0x68] sm:$0xff]  ;;  %v58_v3 = vld [vmem:[#allocation5 + $0x60] sm:$0xff]  ;;  %v57_v4 = vld [vmem:[#allocation5 + $0x58] sm:$0xff]  ;;  %s92_s25 = sshll.u32 %s193_s24, 4  ;;  %s93_s25 = int_to_ptr.vmem [resolvable:$true] %s92_s25 }
   0xd   :  { %v56_v5 = vld [vmem:[#allocation5 + $0x50] sm:$0xff]  ;;  %v55_v6 = vld [vmem:[#allocation5 + $0x48] sm:$0xff]  ;;  %v54_v7 = vld [vmem:[#allocation5 + $0x40] sm:$0xff] }
   0xe   :  { %67 = vmatpush.msra.mxu0 %v60_v1  ;;  %v53_v8 = vld [vmem:[#allocation5 + $0x38] sm:$0xff]  ;;  %v52_v9 = vld [vmem:[#allocation5 + $0x30] sm:$0xff]  ;;  %v51_v10 = vld [vmem:[#allocation5 + $0x28] sm:$0xff] }
   0xf   :  { %v50_v11 = vld [vmem:[#allocation5 + $0x20] sm:$0xff]  ;;  %v49_v12 = vld [vmem:[#allocation5 + $0x18] sm:$0xff]  ;;  %v48_v13 = vld [vmem:[#allocation5 + $0x10] sm:$0xff] }
  0x10   :  { %68 = vmatpush.msra.mxu0 %v59_v2  ;;  %v47_v14 = vld [vmem:[#allocation5 + $0x8] sm:$0xff]  ;;  %v46_v15 = vld [vmem:[#allocation5] sm:$0xff]  ;;  %v45_v16 = vld [vmem:[#allocation2] sm:$0xff] }
  0x11   :  { %v110_v17 = vld [vmem:[%s228_s2] ss:$0 sm:$0xff] }
  0x12   :  { %69 = vmatpush.msra.mxu0 %v58_v3 }
  0x14   :  { %70 = vmatpush.msra.mxu0 %v57_v4 }
  0x16   :  { %71 = vmatpush.msra.mxu0 %v56_v5 }
  0x18   :  { %72 = vmatpush.msra.mxu0 %v55_v6 }
  0x1a   :  { %73 = vmatpush.msra.mxu0 %v54_v7 }
  0x1c   :  { %74 = vmatpush.msra.mxu0 %v53_v8 }
  0x1e   :  { %75 = vmatpush.msra.mxu0 %v52_v9 }
  0x20   :  { %76 = vmatpush.msra.mxu0 %v51_v10 }
  0x22   :  { %77 = vmatpush.msra.mxu0 %v50_v11 }
  0x24   :  { %78 = vmatpush.msra.mxu0 %v49_v12 }
  0x26   :  { %79 = vmatpush.msra.mxu0 %v48_v13 }
  0x28   :  { %80 = vmatpush.msra.mxu0 %v47_v14 }
  0x2a   :  { %81 = vmatpush.msra.mxu0 %v46_v15 }
  0x2b   :  { %82 = vmatmul.f32.vlgmr.msra.gmra.mxu0 %v45_v16 }
  0xa8   :  { %v83_v18 = vpop.f32.mrf.mxu0 }
  0xa9   :  { %v84_v19 = vadd.f32 %v110_v17, %v83_v18 }
  0xab   :  { %86 = vst [vmem:[#allocation7] sm:$0xff] %v84_v19 }
  0xac   :  { %97 = dma.vmem_to_hbm [thread:$0]  %s93_s25, 128, %s95_s28, [#allocation4]  }
  0xad   :  { %187 = dma.done.wait [#allocation4], 128  }
  0xae   :  { %188 = vsyncadd [#allocation4], 4294967168 }
  0xaf   :  { %102 = vsyncpa [#allocation3], 1 }
  0xb0   :  { %103 = vsyncpa [#allocation6], 1 }
  0xb1   :  { %104 = vsyncpa [#allocation4], 1 }

</bundles_post_ra>
